<compile_context>
chip_gen: v5e
topology: v5e:2x2
jax: 0.10.0
libtpu: 0.0.40
codegen_flags: <defaults>
</compile_context>

<pallas_src>
import functools

import numpy as np
import jax
import jax.numpy as jnp
from jax import lax
from jax.experimental import pallas as pl
from jax.experimental.pallas import tpu as pltpu


def _round_up(x, m):
    return ((x + m - 1) // m) * m


def _subpixel_conv3x3_relu_kernel(x_ref, w_ref, b_ref, o_ref, col_ref, *, Cin, Wp, Lpad):
    """One batch element.

    x_ref  : (Cin, Lin)     flattened zero-padded ORIGINAL-resolution image
    w_ref  : (M, 9*Cin)     sub-pixel conv weights, M = s*s*Cout, K is tap-major
    b_ref  : (M, 1)         f32 bias, repeated per parity
    o_ref  : (M, Lpad)      per-parity outputs on a width-padded, lane-dense grid
    col_ref: (9*Cin, Lpad)  VMEM scratch: im2col slab, built once per image
    """
    # Build the im2col slab once: tap t = dy*3 + dx starts at flat offset dy*Wp + dx.
    # Each of the 9 shifted (lane-realigned) slices is materialized exactly once.
    for dy in range(3):
        for dx in range(3):
            t = dy * 3 + dx
            off = dy * Wp + dx
            col_ref[t * Cin:(t + 1) * Cin, :] = x_ref[:, off:off + Lpad]

    # One fused MXU call covering all 9 taps and all s*s output parities; f32 accum.
    acc = jnp.dot(w_ref[...], col_ref[...], preferred_element_type=jnp.float32)
    # Single bias add (was 9 accumulator adds + bias add) and ReLU, in f32.
    o_ref[...] = jnp.maximum(acc + b_ref[...], 0.0).astype(o_ref.dtype)


def upsample_block_forward(x, weight, bias, *, scale=2, out_shape=None,
                           compute_dtype=jnp.float32):
    """Equivalent of UpsampleBlock.forward.

    x: (..., Cin, H, W) f32; weight: (Cout, Cin, 3, 3); bias: (Cout,).
    compute_dtype: dtype of the matmul operands (jnp.bfloat16 recommended on v6e/v7x);
    accumulation / bias / ReLU / output stay float32.
    """
    if out_shape is not None:
        # TODO(synk): the F.interpolate(size=out_shape) path (arbitrary nearest resize)
        # is not ported to the sub-pixel Pallas kernel; only the module's default
        # scale_factor path is implemented here.
        raise NotImplementedError("out_shape path not ported to the Pallas kernel")

    s = int(scale)
    assert s >= 1 and s == scale, "integer scale_factor expected"

    extra_dims = x.shape[:-3]
    Cin, H, W = x.shape[-3:]
    Cout = weight.shape[0]
    xf = x.reshape((-1, Cin, H, W))
    N = xf.shape[0]

    Hp, Wp = H + 2, W + 2            # original resolution + conv/upsample halo
    Lout = H * Wp                    # valid flattened output length per parity image
    Lpad = _round_up(Lout, 128)      # lane-dense output width -> unmasked stores
    Lin = _round_up(2 * Wp + 2 + Lpad, 128)  # every shifted slice stays in bounds

    # ---- glue (original resolution only, a few KB): zero-pad by 1, flatten, tail-pad.
    # No s^2-inflated upsampled tensor is ever materialized in HBM.
    x_pad = jnp.pad(xf, ((0, 0), (0, 0), (1, 1), (1, 1)))          # (N, Cin, Hp, Wp)
    x_flat = x_pad.reshape(N, Cin, Hp * Wp)
    x_flat = jnp.pad(x_flat, ((0, 0), (0, 0), (0, Lin - Hp * Wp)))
    x_flat = x_flat.astype(compute_dtype)

    # ---- sub-pixel weight recombination (trace-time, tiny) ----
    # For output row y = s*m + p and tap ky, the nearest-upsampled + padded input row
    # maps to padded ORIGINAL row m + d with d = 1 + floor((p + ky - 1) / s) in {0,1,2}
    # (boundary zeros line up exactly with the 1-pixel zero pad of the original image).
    sel = np.zeros((s, 3, 3), np.float32)          # sel[p, d, k]
    for p in range(s):
        for k in range(3):
            sel[p, 1 + (p + k - 1) // s, k] = 1.0
    sel = jnp.asarray(sel)
    # Wsp[py, px, o, dy, dx, c] = sum_{ky,kx} sel[py,dy,ky] * sel[px,dx,kx] * W[o,c,ky,kx]
    wsp = jnp.einsum("pdk,qel,ockl->pqodec", sel, sel, weight)
    M = s * s * Cout
    w_lhs = wsp.reshape(M, 9 * Cin).astype(compute_dtype)   # rows (py,px,o); cols (dy,dx,c)
    b_lhs = jnp.tile(bias, (s * s,)).reshape(M, 1).astype(jnp.float32)

    kernel = functools.partial(_subpixel_conv3x3_relu_kernel, Cin=Cin, Wp=Wp, Lpad=Lpad)
    out_flat = pl.pallas_call(
        kernel,
        out_shape=jax.ShapeDtypeStruct((N, M, Lpad), jnp.float32),
        grid=(N,),
        in_specs=[
            pl.BlockSpec((None, Cin, Lin), lambda n: (n, 0, 0)),
            pl.BlockSpec((M, 9 * Cin), lambda n: (0, 0)),   # constant block: no re-DMA
            pl.BlockSpec((M, 1), lambda n: (0, 0)),
        ],
        out_specs=pl.BlockSpec((None, M, Lpad), lambda n: (n, 0, 0)),
        scratch_shapes=[pltpu.VMEM((9 * Cin, Lpad), compute_dtype)],
        compiler_params=pltpu.CompilerParams(dimension_semantics=("parallel",)),
    )(x_flat, w_lhs, b_lhs)

    # ---- glue: parity interleave + crop of the (small, final-size) output ----
    out = out_flat[:, :, :Lout].reshape(N, s, s, Cout, H, Wp)[:, :, :, :, :, :W]
    out = jnp.transpose(out, (0, 3, 4, 1, 5, 2))             # (N, Cout, H, py, W, px)
    out = out.reshape(N, Cout, s * H, s * W)
    return out.reshape(extra_dims + (Cout, s * H, s * W))


def _reference_forward(x, weight, bias, *, scale=2):
    """Pure-JAX reference (mirrors the PyTorch module)."""
    extra_dims = x.shape[:-3]
    Cin, H, W = x.shape[-3:]
    xf = x.reshape((-1, Cin, H, W))
    hi = jnp.arange(H * scale) // scale
    wi = jnp.arange(W * scale) // scale
    up = xf[:, :, hi, :][:, :, :, wi]
    y = lax.conv_general_dilated(
        up, weight, window_strides=(1, 1), padding=((1, 1), (1, 1)),
        dimension_numbers=("NCHW", "OIHW", "NCHW"))
    y = jnp.maximum(y + bias[None, :, None, None], 0.0)
    return y.reshape(extra_dims + y.shape[-3:])


if __name__ == "__main__":
    in_channels, out_channels, scale = 4, 8, 2
    B, H, W = 2, 16, 16

    key = jax.random.PRNGKey(0)
    kx, kw, kb = jax.random.split(key, 3)

    x = jax.random.normal(kx, (B, in_channels, H, W), dtype=jnp.float32)

    # Deterministic init mimicking nn.Conv2d defaults (uniform +- 1/sqrt(fan_in)).
    fan_in = in_channels * 3 * 3
    bound = 1.0 / (fan_in ** 0.5)
    weight = jax.random.uniform(kw, (out_channels, in_channels, 3, 3),
                                minval=-bound, maxval=bound, dtype=jnp.float32)
    bias = jax.random.uniform(kb, (out_channels,),
                              minval=-bound, maxval=bound, dtype=jnp.float32)

    ref = _reference_forward(x, weight, bias, scale=scale)

    # f32 matmul operands (default; v5e-friendly) — tight check.
    out = upsample_block_forward(x, weight, bias, scale=scale)
    out = jax.block_until_ready(out)
    assert out.shape == (B, out_channels, H * scale, W * scale), out.shape
    assert jnp.allclose(out, ref, atol=1e-4, rtol=1e-4), "f32 kernel mismatch vs reference"

    # bf16 MXU operands (recommended on v6e/v7x); accumulation stays f32 — looser check.
    out_bf16 = upsample_block_forward(x, weight, bias, scale=scale,
                                      compute_dtype=jnp.bfloat16)
    out_bf16 = jax.block_until_ready(out_bf16)
    assert jnp.allclose(out_bf16, ref, atol=5e-2, rtol=5e-2), "bf16 kernel mismatch vs reference"

    print("KERNEL_OK")
</pallas_src>

<mosaic_0001>
module attributes {stable_mosaic.version = 11 : i64} {
  func.func @_subpixel_conv3x3_relu_kernel(%arg0: i32, %arg1: memref<1x4x512xf32, #tpu.memory_space<vmem>>, %arg2: memref<32x36xf32, #tpu.memory_space<vmem>>, %arg3: memref<32x1xf32, #tpu.memory_space<vmem>>, %arg4: memref<1x32x384xf32, #tpu.memory_space<vmem>>, %arg5: memref<36x384xf32, #tpu.memory_space<vmem>>) attributes {dimension_semantics = [#tpu.dimension_semantics<parallel>], iteration_bounds = array<i64: 2>, scalar_prefetch = 0 : i64, scratch_operands = 1 : i64, tpu.core_type = #tpu.core_type<tc>, window_params = [{transform_indices = @transform_0, window_bounds = array<i64: 1, 4, 512>}, {pipeline_mode = #tpu.pipeline_mode<synchronous>, transform_indices = @transform_1, window_bounds = array<i64: 32, 36>}, {pipeline_mode = #tpu.pipeline_mode<synchronous>, transform_indices = @transform_2, window_bounds = array<i64: 32, 1>}, {transform_indices = @transform_3, window_bounds = array<i64: 1, 32, 384>}]} {
    %c0 = arith.constant 0 : index
    %c0_0 = arith.constant 0 : index
    %c0_1 = arith.constant 0 : index
    %0 = vector.load %arg1[%c0, %c0_0, %c0_1] : memref<1x4x512xf32, #tpu.memory_space<vmem>>, vector<1x4x384xf32>
    %1 = vector.shape_cast %0 : vector<1x4x384xf32> to vector<4x384xf32>
    %c0_2 = arith.constant 0 : index
    %c0_3 = arith.constant 0 : index
    %2 = vector.load %arg5[%c0_2, %c0_3] : memref<36x384xf32, #tpu.memory_space<vmem>>, vector<4x384xf32>
    tpu.vector_store %arg5[%c0_2, %c0_3], %1 {strides = array<i32>} : memref<36x384xf32, #tpu.memory_space<vmem>>, vector<4x384xf32>,
    %c0_4 = arith.constant 0 : index
    %c0_5 = arith.constant 0 : index
    %c1 = arith.constant 1 : index
    %3 = vector.load %arg1[%c0_4, %c0_5, %c1] : memref<1x4x512xf32, #tpu.memory_space<vmem>>, vector<1x4x384xf32>
    %4 = vector.shape_cast %3 : vector<1x4x384xf32> to vector<4x384xf32>
    %c4 = arith.constant 4 : index
    %c0_6 = arith.constant 0 : index
    %5 = vector.load %arg5[%c4, %c0_6] : memref<36x384xf32, #tpu.memory_space<vmem>>, vector<4x384xf32>
    tpu.vector_store %arg5[%c4, %c0_6], %4 {strides = array<i32>} : memref<36x384xf32, #tpu.memory_space<vmem>>, vector<4x384xf32>,
    %c0_7 = arith.constant 0 : index
    %c0_8 = arith.constant 0 : index
    %c2 = arith.constant 2 : index
    %6 = vector.load %arg1[%c0_7, %c0_8, %c2] : memref<1x4x512xf32, #tpu.memory_space<vmem>>, vector<1x4x384xf32>
    %7 = vector.shape_cast %6 : vector<1x4x384xf32> to vector<4x384xf32>
    %c8 = arith.constant 8 : index
    %c0_9 = arith.constant 0 : index
    %8 = vector.load %arg5[%c8, %c0_9] : memref<36x384xf32, #tpu.memory_space<vmem>>, vector<4x384xf32>
    tpu.vector_store %arg5[%c8, %c0_9], %7 {strides = array<i32>} : memref<36x384xf32, #tpu.memory_space<vmem>>, vector<4x384xf32>,
    %c0_10 = arith.constant 0 : index
    %c0_11 = arith.constant 0 : index
    %c18 = arith.constant 18 : index
    %9 = vector.load %arg1[%c0_10, %c0_11, %c18] : memref<1x4x512xf32, #tpu.memory_space<vmem>>, vector<1x4x384xf32>
    %10 = vector.shape_cast %9 : vector<1x4x384xf32> to vector<4x384xf32>
    %c12 = arith.constant 12 : index
    %c0_12 = arith.constant 0 : index
    %11 = vector.load %arg5[%c12, %c0_12] : memref<36x384xf32, #tpu.memory_space<vmem>>, vector<4x384xf32>
    tpu.vector_store %arg5[%c12, %c0_12], %10 {strides = array<i32>} : memref<36x384xf32, #tpu.memory_space<vmem>>, vector<4x384xf32>,
    %c0_13 = arith.constant 0 : index
    %c0_14 = arith.constant 0 : index
    %c19 = arith.constant 19 : index
    %12 = vector.load %arg1[%c0_13, %c0_14, %c19] : memref<1x4x512xf32, #tpu.memory_space<vmem>>, vector<1x4x384xf32>
    %13 = vector.shape_cast %12 : vector<1x4x384xf32> to vector<4x384xf32>
    %c16 = arith.constant 16 : index
    %c0_15 = arith.constant 0 : index
    %14 = vector.load %arg5[%c16, %c0_15] : memref<36x384xf32, #tpu.memory_space<vmem>>, vector<4x384xf32>
    tpu.vector_store %arg5[%c16, %c0_15], %13 {strides = array<i32>} : memref<36x384xf32, #tpu.memory_space<vmem>>, vector<4x384xf32>,
    %c0_16 = arith.constant 0 : index
    %c0_17 = arith.constant 0 : index
    %c20 = arith.constant 20 : index
    %15 = vector.load %arg1[%c0_16, %c0_17, %c20] : memref<1x4x512xf32, #tpu.memory_space<vmem>>, vector<1x4x384xf32>
    %16 = vector.shape_cast %15 : vector<1x4x384xf32> to vector<4x384xf32>
    %c20_18 = arith.constant 20 : index
    %c0_19 = arith.constant 0 : index
    %17 = vector.load %arg5[%c20_18, %c0_19] : memref<36x384xf32, #tpu.memory_space<vmem>>, vector<4x384xf32>
    tpu.vector_store %arg5[%c20_18, %c0_19], %16 {strides = array<i32>} : memref<36x384xf32, #tpu.memory_space<vmem>>, vector<4x384xf32>,
    %c0_20 = arith.constant 0 : index
    %c0_21 = arith.constant 0 : index
    %c36 = arith.constant 36 : index
    %18 = vector.load %arg1[%c0_20, %c0_21, %c36] : memref<1x4x512xf32, #tpu.memory_space<vmem>>, vector<1x4x384xf32>
    %19 = vector.shape_cast %18 : vector<1x4x384xf32> to vector<4x384xf32>
    %c24 = arith.constant 24 : index
    %c0_22 = arith.constant 0 : index
    %20 = vector.load %arg5[%c24, %c0_22] : memref<36x384xf32, #tpu.memory_space<vmem>>, vector<4x384xf32>
    tpu.vector_store %arg5[%c24, %c0_22], %19 {strides = array<i32>} : memref<36x384xf32, #tpu.memory_space<vmem>>, vector<4x384xf32>,
    %c0_23 = arith.constant 0 : index
    %c0_24 = arith.constant 0 : index
    %c37 = arith.constant 37 : index
    %21 = vector.load %arg1[%c0_23, %c0_24, %c37] : memref<1x4x512xf32, #tpu.memory_space<vmem>>, vector<1x4x384xf32>
    %22 = vector.shape_cast %21 : vector<1x4x384xf32> to vector<4x384xf32>
    %c28 = arith.constant 28 : index
    %c0_25 = arith.constant 0 : index
    %23 = vector.load %arg5[%c28, %c0_25] : memref<36x384xf32, #tpu.memory_space<vmem>>, vector<4x384xf32>
    tpu.vector_store %arg5[%c28, %c0_25], %22 {strides = array<i32>} : memref<36x384xf32, #tpu.memory_space<vmem>>, vector<4x384xf32>,
    %c0_26 = arith.constant 0 : index
    %c0_27 = arith.constant 0 : index
    %c38 = arith.constant 38 : index
    %24 = vector.load %arg1[%c0_26, %c0_27, %c38] : memref<1x4x512xf32, #tpu.memory_space<vmem>>, vector<1x4x384xf32>
    %25 = vector.shape_cast %24 : vector<1x4x384xf32> to vector<4x384xf32>
    %c32 = arith.constant 32 : index
    %c0_28 = arith.constant 0 : index
    %26 = vector.load %arg5[%c32, %c0_28] : memref<36x384xf32, #tpu.memory_space<vmem>>, vector<4x384xf32>
    tpu.vector_store %arg5[%c32, %c0_28], %25 {strides = array<i32>} : memref<36x384xf32, #tpu.memory_space<vmem>>, vector<4x384xf32>,
    %c0_29 = arith.constant 0 : index
    %c0_30 = arith.constant 0 : index
    %27 = vector.load %arg2[%c0_29, %c0_30] : memref<32x36xf32, #tpu.memory_space<vmem>>, vector<32x36xf32>
    %c0_31 = arith.constant 0 : index
    %c0_32 = arith.constant 0 : index
    %28 = vector.load %arg5[%c0_31, %c0_32] : memref<36x384xf32, #tpu.memory_space<vmem>>, vector<36x384xf32>
    %cst = arith.constant dense<0.000000e+00> : vector<32x384xf32>
    %29 = tpu.matmul %27, %28, %cst {dimension_numbers = #tpu.dot_dimension_numbers<[1], [0], [0], [1], [0, 0, 1, 1], [], []>} : vector<32x36xf32>, vector<36x384xf32>, vector<32x384xf32> -> vector<32x384xf32>
    %c0_33 = arith.constant 0 : index
    %c0_34 = arith.constant 0 : index
    %30 = vector.load %arg3[%c0_33, %c0_34] : memref<32x1xf32, #tpu.memory_space<vmem>>, vector<32x1xf32>
    %31 = vector.broadcast %30 : vector<32x1xf32> to vector<32x384xf32>
    %32 = arith.addf %29, %31 : vector<32x384xf32>
    %cst_35 = arith.constant 0.000000e+00 : f32
    %33 = vector.broadcast %cst_35 : f32 to vector<32x384xf32>
    %34 = arith.maximumf %32, %33 : vector<32x384xf32>
    %c0_36 = arith.constant 0 : index
    %c0_37 = arith.constant 0 : index
    %c0_38 = arith.constant 0 : index
    %35 = vector.load %arg4[%c0_36, %c0_37, %c0_38] : memref<1x32x384xf32, #tpu.memory_space<vmem>>, vector<1x32x384xf32>
    %36 = vector.shape_cast %35 : vector<1x32x384xf32> to vector<32x384xf32>
    %37 = vector.shape_cast %34 : vector<32x384xf32> to vector<1x32x384xf32>
    tpu.vector_store %arg4[%c0_36, %c0_37, %c0_38], %37 {strides = array<i32>} : memref<1x32x384xf32, #tpu.memory_space<vmem>>, vector<1x32x384xf32>,
    return
  }
  func.func @transform_0(%arg0: i32) -> (i32, i32, i32) {
    %c0_i32 = arith.constant 0 : i32
    %c0_i32_0 = arith.constant 0 : i32
    %c0_i32_1 = arith.constant 0 : i32
    return %arg0, %c0_i32, %c0_i32_0 : i32, i32, i32
  }
  func.func @transform_1(%arg0: i32) -> (i32, i32) {
    %c0_i32 = arith.constant 0 : i32
    %c0_i32_0 = arith.constant 0 : i32
    %c0_i32_1 = arith.constant 0 : i32
    return %c0_i32, %c0_i32_0 : i32, i32
  }
  func.func @transform_2(%arg0: i32) -> (i32, i32) {
    %c0_i32 = arith.constant 0 : i32
    %c0_i32_0 = arith.constant 0 : i32
    %c0_i32_1 = arith.constant 0 : i32
    return %c0_i32, %c0_i32_0 : i32, i32
  }
  func.func @transform_3(%arg0: i32) -> (i32, i32, i32) {
    %c0_i32 = arith.constant 0 : i32
    %c0_i32_0 = arith.constant 0 : i32
    %c0_i32_1 = arith.constant 0 : i32
    return %arg0, %c0_i32, %c0_i32_0 : i32, i32, i32
  }
}

</mosaic_0001>

<bundles_post_ra>
// kernel: tpu_custom_call.1
= control target key start
LH: loop header
LB: loop body
LE: loop exit
PB: predicated region body
PF: predicated region fallthrough
CT: control target
= control target key end

     0   :  { %8 = vsyncpa [#allocation4], 0  ;;  %s1165_s0 = inlined_call_operand.vmem [shape: f32[2,4,512], index: 0, kind: input, shape index: {}]   ;;  %s1166_s1 = inlined_call_operand.hbm [shape: f32[32,36], index: 1, kind: input, shape index: {}]   ;;  %s1167_s2 = inlined_call_operand.vmem [shape: f32[32,1], index: 2, kind: input, shape index: {}]   ;;  %s1168_s3 = inlined_call_operand.hbm [shape: f32[2,32,384], index: 3, kind: output, shape index: {}]  }
   0x1   :  { %9 = vsyncpa [#allocation5], 0 }
   0x2   :  { %11 = vsyncpa [#allocation5 + $0x1], 0  ;;  %s942_s12 = smov 0   ;;  %s944_s13 = smov 0  }
   0x3   :  { %s946_s14 = smov 0   ;;  %s948_s15 = smov 0  }
   0x4 LB: > { %s963_s16 = sadd.s32 4294967295, %s906_s15   ;;  %s705_s17 = sadd.s32 4294967294, %s906_s15   ;;  %s906_s15 = sphi %s948_s15, %s1174_s15   ;;  %s902_s14 = sphi %s946_s14, %s1173_s14   ;;  %s898_s13 = sphi %s944_s13, %s1172_s13   ;;  %s894_s12 = sphi %s942_s12, %s1171_s12  }
   0x5   : > { %s967_s18 = sadd.s32 1, %s906_s15   ;;  %s92_s19 = sadd.s32 1, %s902_s14 }
   0x6   : > { %s89_s20 = ssub.s32 %s906_s15, %s967_s18  ;;  %p102_p0 = scmp.ne.s32.totalorder %s902_s14, %s898_s13 }
   0x7   : > { %p90_p1 = scmp.eq.s32.totalorder %s89_s20, 0  ;;  %p103_p2 = scmp.eq.s32.totalorder %s963_s16, 1 }
   0x8   : > { %p108_p3 = scmp.ne.s32.totalorder %s898_s13, %s894_s12  ;;  %p109_p4 = scmp.eq.s32.totalorder %s705_s17, 1 }
   0x9   : > { %s978_s21 = scalar_select %p90_p1, %s902_s14, %s92_s19  }
   0xa   : > { %p980_p5 = por %p103_p2, %p102_p0  ;;  %p984_p6 = por %p109_p4, %p108_p3 }
   0xb   : > { %p706_p7 = scmp.ge.s32.totalorder %s906_s15, 1  ;;  %p116_p8 = scmp.lt.s32.totalorder %s906_s15, 3 }
   0xc   : > { %p758_p9 = scmp.eq.s32.totalorder %s963_s16, 0  ;;  %s127_s26 = sshll.u32 %s1166_s1, 4  ;;  %s128_s26 = int_to_ptr.hbm [resolvable:$true] %s127_s26 }
   0xd   : > { %p117_p10 = pnand %p706_p7, %p116_p8  ;;  %s908_s27 = smov [#allocation3]  }
   0xe   : > { %s129_s28 = sshll.u32 %s908_s27, 4  ;;  %s909_s29 = smov 128   ;;  %s130_s28 = int_to_ptr.vmem [resolvable:$true] %s129_s28 }
   0xf   : > { %p750_p11 = pneg %p117_p10  ;;  %s910_s30 = smov 8  }
  0x10   : > { %156 = sbr.rel (%p117_p10) target bundleno = 416 (0x1a0), region = 32 }
  0x11   : > { %p751_p12 = pnand %p758_p9, %p750_p11 }
  0x13   : > { %753 = dma.hbm_to_vmem [thread:$0]  (!%p751_p12), %s128_s26, 512, %s130_s28, [#allocation4], %s909_s29, %s909_s29, %s910_s30  }
  0x15   : > { %885 = dma.done.wait (%p758_p9), [#allocation4], 512  }
  0x16   : > { %887 = vsyncadd (%p758_p9), [#allocation4], 4294966784  ;;  %p181_p13 = scmp.lt.s32.totalorder %s963_s16, 1  ;;  %s911_s9 = smov 127   ;;  %vm222_vm0 = vcmask 1039360   ;;  %vm251_vm1 = vcmask 1031168  }
  0x17   : > { %s912_s10 = smov 126   ;;  %s913_s11 = smov 110   ;;  %vm281_vm2 = vcmask 900096   ;;  %vm310_vm3 = vcmask 891904   ;;  %vm340_vm4 = vcmask 883712   ;;  %vm399_vm5 = vcmask 744448  }
  0x18   : > { %s182_s4 = scalar_select %p181_p13, %s963_s16, 1  ;;  %vm369_vm6 = vcmask 752640   ;;  %vm428_vm7 = vcmask 736256   ;;  %vm494_vm8 = vcmask 1043456   ;;  %vm481_vm9 = vcmask 293888  }
  0x19   : > { %s914_s17 = smov 109   ;;  %s915_s19 = smov 108  }
  0x1a   : > { %s731_s5 = sshll.u32 %s182_s4, 4  ;;  %s916_s20 = smov 91  }
  0x1b   : > { %s185_s8 = scalar_lea.vmem %s1165_s0, %s731_s5  ;;  %s917_s24 = smov 92  }
  0x1c   : > { %v187_v0 = vld [vmem:[%s185_s8 + $0x8] sm:$0xf]  ;;  %v1005_v1 = vld [vmem:[%s185_s8] sm:$0xff]  ;;  %s918_s25 = smov 90   ;;  %s178_s7 = sand.u32 1, %s898_s13  }
  0x1d   : > { %192 = vst [vmem:[#allocation1 + $0x10] ss:$2 sm:$0xff] %v187_v0  ;;  %v1008_v2 = vld [vmem:[%s185_s8 + $0x8] sm:$0xff]  ;;  %s742_s8 = smul.u32 96, %s178_s7  ;;  %s860_s29 = scalar_lea.hbm %s1168_s3, 192 }
  0x1e   : > { %190 = vst [vmem:[#allocation1] ss:$2 sm:$0xff] %v1005_v1 }
  0x24   : > { %v195_v3 = vld.sshfl [vmem:[#allocation1 + $0x10] sm:$0xff pattern:$0x75316420] }
  0x25   : > { %209 = vst [vmem:[#allocation1 + $0x11] ss:$2 sm:$0xff] %v1008_v2  ;;  %v193_v4 = vld.sshfl [vmem:[#allocation1] sm:$0xff pattern:$0x75316420] }
  0x26   : > { %201 = vst [vmem:[#allocation2 + $0x58] sm:$0xf] %v195_v3  ;;  %v194_v5 = vld.sshfl [vmem:[#allocation1 + $0x8] sm:$0xff pattern:$0x75316420] }
  0x27   : > { %207 = vst [vmem:[#allocation1 + $0x1] ss:$2 sm:$0xff] %v1005_v1 }
  0x28   : > { %199 = vst [vmem:[#allocation2 + $0x30] sm:$0xf] %v193_v4 }
  0x29   : > { %200 = vst [vmem:[#allocation2] sm:$0xf] %v194_v5 }
  0x2c   : > { %v213_v6 = vld.sshfl [vmem:[#allocation1 + $0x18] sm:$0xff pattern:$0x75316420]  ;;  %v212_v7 = vld.sshfl [vmem:[#allocation1 + $0x10] sm:$0xff pattern:$0x75316420] }
  0x2d   : > { %220 = vrot.lane.b32.xlu0 %v213_v6, %s911_s9  ;;  %218 = vrot.lane.b32.xlu2 %v212_v7, %s911_s9  ;;  %238 = vst [vmem:[#allocation1 + $0x10] ss:$2 sm:$0xff] %v1008_v2 }
  0x2e   : > { %v1015_v8 = vld.sshfl [vmem:[#allocation1] sm:$0xff pattern:$0x75316420]  ;;  %v1017_v9 = vld.sshfl [vmem:[#allocation1 + $0x8] sm:$0xff pattern:$0x75316420] }
  0x2f   : > { %236 = vst [vmem:[#allocation1] ss:$2 sm:$0xff] %v1005_v1 }
  0x34   : > { %v241_v10 = vld.sshfl [vmem:[#allocation1 + $0x10] sm:$0xff pattern:$0x75316420]  ;;  %v242_v11 = vld.sshfl [vmem:[#allocation1 + $0x18] sm:$0xff pattern:$0x75316420] }
  0x35   : > { %247 = vrot.lane.b32.xlu1 %v241_v10, %s912_s10  ;;  %249 = vrot.lane.b32.xlu2 %v242_v11, %s912_s10  ;;  %268 = vst [vmem:[#allocation1 + $0x11] ss:$2 sm:$0xff] %v1008_v2 }
  0x36   : > { %v239_v12 = vld.sshfl [vmem:[#allocation1] sm:$0xff pattern:$0x75316420]  ;;  %v1023_v13 = vld.sshfl [vmem:[#allocation1 + $0x8] sm:$0xff pattern:$0x75316420] }
  0x37   : > { %266 = vst [vmem:[#allocation1 + $0x1] ss:$2 sm:$0xff] %v1005_v1 }
  0x3c   : > { %v272_v14 = vld.sshfl [vmem:[#allocation1 + $0x18] sm:$0xff pattern:$0x75316420]  ;;  %v271_v15 = vld.sshfl [vmem:[#allocation1 + $0x10] sm:$0xff pattern:$0x75316420] }
  0x3d   : > { %279 = vrot.lane.b32.xlu1 %v272_v14, %s913_s11  ;;  %277 = vrot.lane.b32.xlu0 %v271_v15, %s913_s11  ;;  %297 = vst [vmem:[#allocation1 + $0x10] ss:$2 sm:$0xff] %v1008_v2 }
  0x3e   : > { %243 = vrot.lane.b32.xlu2 %v239_v12, %s912_s10  ;;  %v269_v16 = vld.sshfl [vmem:[#allocation1] sm:$0xff pattern:$0x75316420]  ;;  %v270_v17 = vld.sshfl [vmem:[#allocation1 + $0x8] sm:$0xff pattern:$0x75316420] }
  0x3f   : > { %295 = vst [vmem:[#allocation1] ss:$2 sm:$0xff] %v1005_v1 }
  0x44   : > { %v301_v18 = vld.sshfl [vmem:[#allocation1 + $0x18] sm:$0xff pattern:$0x75316420]  ;;  %v300_v19 = vld.sshfl [vmem:[#allocation1 + $0x10] sm:$0xff pattern:$0x75316420] }
  0x45   : > { %308 = vrot.lane.b32.xlu1 %v301_v18, %s914_s17  ;;  %306 = vrot.lane.b32.xlu0 %v300_v19, %s914_s17  ;;  %327 = vst [vmem:[#allocation1 + $0x11] ss:$2 sm:$0xff] %v1008_v2 }
  0x46   : > { %v299_v20 = vld.sshfl [vmem:[#allocation1 + $0x8] sm:$0xff pattern:$0x75316420]  ;;  %v298_v21 = vld.sshfl [vmem:[#allocation1] sm:$0xff pattern:$0x75316420] }
  0x47   : > { %304 = vrot.lane.b32.xlu2 %v299_v20, %s914_s17  ;;  %325 = vst [vmem:[#allocation1 + $0x1] ss:$2 sm:$0xff] %v1005_v1 }
  0x4c   : > { %v331_v22 = vld.sshfl [vmem:[#allocation1 + $0x18] sm:$0xff pattern:$0x75316420]  ;;  %v330_v23 = vld.sshfl [vmem:[#allocation1 + $0x10] sm:$0xff pattern:$0x75316420] }
  0x4d   : > { %338 = vrot.lane.b32.xlu0 %v331_v22, %s915_s19  ;;  %302 = vrot.lane.b32.xlu1 %v298_v21, %s914_s17  ;;  %356 = vst [vmem:[#allocation1 + $0x10] ss:$2 sm:$0xff] %v1008_v2 }
  0x4e   : > { %v329_v24 = vld.sshfl [vmem:[#allocation1 + $0x8] sm:$0xff pattern:$0x75316420]  ;;  %v328_v25 = vld.sshfl [vmem:[#allocation1] sm:$0xff pattern:$0x75316420] }
  0x4f   : > { %336 = vrot.lane.b32.xlu2 %v330_v23, %s915_s19  ;;  %354 = vst [vmem:[#allocation1] ss:$2 sm:$0xff] %v1005_v1 }
  0x54   : > { %v359_v26 = vld.sshfl [vmem:[#allocation1 + $0x10] sm:$0xff pattern:$0x75316420]  ;;  %v360_v27 = vld.sshfl [vmem:[#allocation1 + $0x18] sm:$0xff pattern:$0x75316420] }
  0x55   : > { %334 = vrot.lane.b32.xlu1 %v329_v24, %s915_s19  ;;  %332 = vrot.lane.b32.xlu0 %v328_v25, %s915_s19  ;;  %386 = vst [vmem:[#allocation1 + $0x11] ss:$2 sm:$0xff] %v1008_v2  ;;  %v919_v25 = vmov 0  }
  0x56   : > { %v357_v28 = vld.sshfl [vmem:[#allocation1] sm:$0xff pattern:$0x75316420]  ;;  %v358_v29 = vld.sshfl [vmem:[#allocation1 + $0x8] sm:$0xff pattern:$0x75316420]  ;;  %808 = vset.pattern.permute.xlu0 %v919_v25  ;;  %809 = vset.pattern.permute.xlu1 %v919_v25 }
  0x57   : > { %384 = vst [vmem:[#allocation1 + $0x1] ss:$2 sm:$0xff] %v1005_v1  ;;  %807 = vset.pattern.permute.xlu2 %v919_v25 }
  0x5c   : > { %v389_v30 = vld.sshfl [vmem:[#allocation1 + $0x10] sm:$0xff pattern:$0x75316420]  ;;  %v390_v31 = vld.sshfl [vmem:[#allocation1 + $0x18] sm:$0xff pattern:$0x75316420] }
  0x5d   : > { %395 = vrot.lane.b32.xlu2 %v389_v30, %s916_s20  ;;  %365 = vrot.lane.b32.xlu1 %v359_v26, %s917_s24  ;;  %415 = vst [vmem:[#allocation1 + $0x10] ss:$2 sm:$0xff] %v1008_v2 }
  0x5e   : > { %361 = vrot.lane.b32.xlu0 %v357_v28, %s917_s24  ;;  %v388_v32 = vld.sshfl [vmem:[#allocation1 + $0x8] sm:$0xff pattern:$0x75316420]  ;;  %v387_v33 = vld.sshfl [vmem:[#allocation1] sm:$0xff pattern:$0x75316420] }
  0x5f   : > { %413 = vst [vmem:[#allocation1] ss:$2 sm:$0xff] %v1005_v1 }
  0x64   : > { %v418_v34 = vld.sshfl [vmem:[#allocation1 + $0x10] sm:$0xff pattern:$0x75316420]  ;;  %v419_v36 = vld.sshfl [vmem:[#allocation1 + $0x18] sm:$0xff pattern:$0x75316420] }
  0x65   : > { %397 = vrot.lane.b32.xlu2 %v390_v31, %s916_s20  ;;  %367 = vrot.lane.b32.xlu1 %v360_v27, %s917_s24 }
  0x66   : > { %393 = vrot.lane.b32.xlu0 %v388_v32, %s916_s20  ;;  %v417_v35 = vld.sshfl [vmem:[#allocation1 + $0x8] sm:$0xff pattern:$0x75316420]  ;;  %v416_v37 = vld.sshfl [vmem:[#allocation1] sm:$0xff pattern:$0x75316420] }
  0x67   : > { %v458_v32 = vld [vmem:[%s1167_s2 + $0x8] sm:$0xff] }
  0x6d   : > { %363 = vrot.lane.b32.xlu1 %v358_v29, %s917_s24  ;;  %391 = vrot.lane.b32.xlu2 %v387_v33, %s916_s20  ;;  %v459_v33 = vld [vmem:[%s1167_s2 + $0x10] sm:$0xff]  ;;  %s616_s24 = scalar_lea.sflag [#allocation5], %s178_s7 }
  0x6e   : > { %424 = vrot.lane.b32.xlu0 %v418_v34, %s918_s25  ;;  %v457_v34 = vld [vmem:[%s1167_s2] sm:$0xff] }
  0x75   : > { %273 = vrot.lane.b32.xlu1 %v269_v16, %s913_s11  ;;  %422 = vrot.lane.b32.xlu2 %v417_v35, %s918_s25 }
  0x76   : > { %426 = vrot.lane.b32.xlu0 %v419_v36, %s918_s25 }
  0x7d   : > { %275 = vrot.lane.b32.xlu2 %v270_v17, %s913_s11  ;;  %420 = vrot.lane.b32.xlu1 %v416_v37, %s918_s25 }
  0x7e   : > { %245 = vrot.lane.b32.xlu0 %v1023_v13, %s912_s10  ;;  %s743_s10 = smul.u32 96, %s963_s16 }
  0x80   : > { %s627_s19 = scalar_lea.hbm %s1168_s3, %s743_s10 }
  0x81   : > { %s630_s20 = sshll.u32 %s627_s19, 4  ;;  %s631_s20 = int_to_ptr.hbm [resolvable:$true] %s630_s20 }
  0x82   : > { %s854_s25 = sshra.s32 %s631_s20, 4  ;;  %s855_s25 = int_to_ptr.hbm [resolvable:$true] %s854_s25 }
  0x83   : > { %s856_s26 = scalar_lea.hbm %s855_s25, 96  ;;  %p861_p3 = scmp.lt.s32.totalorder %s855_s25, %s1168_s3 }
  0x84   : > { %p857_p0 = scmp.ne.s32.totalorder %s855_s25, %s856_s26  ;;  %p862_p4 = scmp.lt.s32.totalorder %s860_s29, %s856_s26 }
  0x85   : > { %216 = vrot.lane.b32.xlu1 %v1017_v9, %s911_s9  ;;  %463 = vperm.xlu2 %807, %v457_v34  }
  0x86   : > { %214 = vrot.lane.b32.xlu0 %v1015_v8, %s911_s9  ;;  %s1117_s9 = scalar_lea.vmem [#allocation6], %s742_s8  ;;  %p858_p1 = pnand %p857_p0, %p980_p5 }
  0x87   : > { %v1047_v38 = vpop.permute.xlu2 %218  ;;  %s628_s16 = sshll.u32 %s1117_s9, 4  ;;  %p863_p7 = por %p862_p4, %p861_p3  ;;  %s629_s16 = int_to_ptr.vmem [resolvable:$true] %s628_s16 }
  0x88   : > { %p859_p2 = pneg %p858_p1 }
  0x8a   : > { %p864_p8 = pnand %p863_p7, %p859_p2 }
  0x8d   : > { %473 = vperm.xlu1 %809, %v459_v33  }
  0x8e   : > { %468 = vperm.xlu0 %808, %v458_v32  }
  0x8f   : > { %v250_v39 = vpop.permute.xlu2 %249 }
  0x98   : > { %v1049_v40 = vpop.permute.xlu2 %243 }
  0x9f   : > { %v221_v41 = vpop.permute.xlu0 %220 }
  0xa0   : > { %v225_v42 = vsel %vm222_vm0, %v1047_v38, %v221_v41 }
  0xa1   : > { %231 = vst [vmem:[#allocation2 + $0x58] sm:$0xf0] %v225_v42  ;;  %v305_v43 = vpop.permute.xlu2 %304  ;;  %v438_v42 = vld [vmem:[#allocation3] sm:$0xff] }
  0xa7   : > { %v1053_v44 = vpop.permute.xlu1 %247 }
  0xa8   : > { %v254_v45 = vsel %vm251_vm1, %v1053_v44, %v250_v39 }
  0xa9   : > { %260 = vst [vmem:[#allocation2 + $0x68] sm:$0xf] %v254_v45  ;;  %v337_v46 = vpop.permute.xlu2 %336 }
  0xaf   : > { %v280_v47 = vpop.permute.xlu1 %279  ;;  %v278_v48 = vpop.permute.xlu0 %277 }
  0xb0   : > { %v284_v49 = vsel %vm281_vm2, %v278_v48, %v280_v47 }
  0xb1   : > { %290 = vst [vmem:[#allocation2 + $0x68] sm:$0xf0] %v284_v49 }
  0xb7   : > { %v309_v50 = vpop.permute.xlu1 %308  ;;  %v307_v51 = vpop.permute.xlu0 %306 }
  0xb8   : > { %v312_v52 = vsel %vm310_vm3, %v305_v43, %v307_v51  ;;  %v313_v53 = vsel %vm310_vm3, %v307_v51, %v309_v50  ;;  %v396_v54 = vpop.permute.xlu2 %395  ;;  %v447_v36 = vld [vmem:[#allocation2 + $0x68] sm:$0xff]  ;;  %v439_v50 = vld [vmem:[#allocation3 + $0x8] sm:$0xff] }
  0xb9   : > { %318 = vst [vmem:[#allocation2 + $0x48] sm:$0xf] %v312_v52  ;;  %v440_v52 = vld [vmem:[#allocation3 + $0x10] sm:$0xff] }
  0xba   : > { %319 = vst [vmem:[#allocation2 + $0x40] sm:$0xf] %v313_v53  ;;  %v441_v53 = vld [vmem:[#allocation3 + $0x18] sm:$0xff] }
  0xbf   : > { %v339_v55 = vpop.permute.xlu0 %338  ;;  %v303_v56 = vpop.permute.xlu1 %302 }
  0xc0   : > { %v343_v57 = vsel %vm340_vm4, %v337_v46, %v339_v55  ;;  %v398_v58 = vpop.permute.xlu2 %397  ;;  %v311_v59 = vsel %vm310_vm3, %v303_v56, %v305_v43 }
  0xc1   : > { %349 = vst [vmem:[#allocation2 + $0x40] sm:$0xf0] %v343_v57  ;;  %v402_v60 = vsel %vm399_vm5, %v396_v54, %v398_v58 }
  0xc2   : > { %408 = vst [vmem:[#allocation2 + $0x38] sm:$0xf0] %v402_v60 }
  0xc3   : > { %317 = vst [vmem:[#allocation2 + $0x8] sm:$0xf] %v311_v59 }
  0xc7   : > { %v335_v61 = vpop.permute.xlu1 %334  ;;  %v333_v62 = vpop.permute.xlu0 %332 }
  0xc8   : > { %v342_v63 = vsel %vm340_vm4, %v335_v61, %v337_v46  ;;  %v341_v0 = vsel %vm340_vm4, %v333_v62, %v335_v61  ;;  %v392_v1 = vpop.permute.xlu2 %391  ;;  %v450_v35 = vld [vmem:[#allocation2 + $0x40] sm:$0xff] }
  0xc9   : > { %348 = vst [vmem:[#allocation2 + $0x48] sm:$0xf0] %v342_v63 }
  0xca   : > { %347 = vst [vmem:[#allocation2 + $0x8] sm:$0xf0] %v341_v0 }
  0xcf   : > { %v366_v2 = vpop.permute.xlu1 %365 }
  0xd0   : > { %v362_v3 = vpop.permute.xlu0 %361  ;;  %v423_v4 = vpop.permute.xlu2 %422  ;;  %v1072_v23 = vld [vmem:[#allocation2 + $0x48] sm:$0xff] }
  0xd1   : > { %v448_v47 = vld [vmem:[#allocation2 + $0x8] sm:$0xff] }
  0xd7   : > { %v368_v5 = vpop.permute.xlu1 %367 }
  0xd8   : > { %v372_v6 = vsel %vm369_vm6, %v366_v2, %v368_v5  ;;  %v394_v7 = vpop.permute.xlu0 %393  ;;  %v276_v8 = vpop.permute.xlu2 %275 }
  0xd9   : > { %378 = vst [vmem:[#allocation2 + $0x38] sm:$0xf] %v372_v6  ;;  %v400_v9 = vsel %vm399_vm5, %v392_v1, %v394_v7  ;;  %v401_v10 = vsel %vm399_vm5, %v394_v7, %v396_v54  ;;  %v283_v11 = vsel %vm281_vm2, %v276_v8, %v278_v48 }
  0xda   : > { %406 = vst [vmem:[#allocation2 + $0x20] sm:$0xf0] %v400_v9 }
  0xdb   : > { %407 = vst [vmem:[#allocation2 + $0x10] sm:$0xf0] %v401_v10 }
  0xdc   : > { %289 = vst [vmem:[#allocation2 + $0x50] sm:$0xf0] %v283_v11 }
  0xdf   : > { %v364_v12 = vpop.permute.xlu1 %363 }
  0xe0   : > { %v370_v13 = vsel %vm369_vm6, %v362_v3, %v364_v12  ;;  %v371_v14 = vsel %vm369_vm6, %v364_v12, %v366_v2  ;;  %v425_v15 = vpop.permute.xlu0 %424  ;;  %v453_v31 = vld [vmem:[#allocation2 + $0x38] sm:$0xff]  ;;  %v464_v54 = vpop.permute.xlu2 %463 }
  0xe1   : > { %376 = vst [vmem:[#allocation2 + $0x20] sm:$0xf] %v370_v13  ;;  %v430_v16 = vsel %vm428_vm7, %v423_v4, %v425_v15 }
  0xe2   : > { %377 = vst [vmem:[#allocation2 + $0x10] sm:$0xf] %v371_v14 }
  0xe3   : > { %436 = vst [vmem:[#allocation2 + $0x70] sm:$0xf] %v430_v16 }
  0xe7   : > { %v274_v17 = vpop.permute.xlu1 %273 }
  0xe8   : > { %v282_v18 = vsel %vm281_vm2, %v274_v17, %v276_v8  ;;  %v427_v19 = vpop.permute.xlu0 %426  ;;  %v451_v46 = vld [vmem:[#allocation2 + $0x20] sm:$0xff] }
  0xe9   : > { %288 = vst [vmem:[#allocation2 + $0x18] sm:$0xf0] %v282_v18  ;;  %v431_v20 = vsel %vm428_vm7, %v425_v15, %v427_v19  ;;  %v1069_v22 = vld [vmem:[#allocation2 + $0x10] sm:$0xff] }
  0xea   : > { %437 = vst [vmem:[#allocation2 + $0x28] sm:$0xf] %v431_v20  ;;  %v1065_v21 = vld [vmem:[#allocation2 + $0x70] sm:$0xf] }
  0xeb   : > { %737 = vmatpush.msk.msra.mxu1 %vm494_vm8, %v1065_v21 }
  0xed   : > { %738 = vmatpush.msra.mxu1 %v1069_v22 }
  0xef   : > { %739 = vmatpush.msra.mxu1 %v1072_v23  ;;  %v421_v24 = vpop.permute.xlu1 %420 }
  0xf0   : > { %v246_v26 = vpop.permute.xlu0 %245  ;;  %v429_v27 = vsel %vm428_vm7, %v421_v24, %v423_v4 }
  0xf1   : > { %v252_v28 = vsel %vm251_vm1, %v1049_v40, %v246_v26  ;;  %v253_v29 = vsel %vm251_vm1, %v246_v26, %v1053_v44  ;;  %435 = vst [vmem:[#allocation2 + $0x60] sm:$0xf] %v429_v27  ;;  %v456_v30 = vld [vmem:[#allocation2 + $0x28] sm:$0xf]  ;;  %v444_v44 = vld [vmem:[#allocation2 + $0x58] sm:$0xff] }
  0xf2   : > { %258 = vst [vmem:[#allocation2 + $0x18] sm:$0xf] %v252_v28  ;;  %723 = vmatpush.msk.msra.mxu2 %vm494_vm8, %v456_v30 }
  0xf3   : > { %259 = vst [vmem:[#allocation2 + $0x50] sm:$0xf] %v253_v29 }
  0xf4   : > { %574 = vmatpush.msra.mxu2 %v453_v31 }
  0xf6   : > { %575 = vmatpush.msra.mxu2 %v450_v35 }
  0xf7   : > { %v217_v37 = vpop.permute.xlu1 %216 }
  0xf8   : > { %576 = vmatpush.msra.mxu2 %v447_v36  ;;  %v215_v39 = vpop.permute.xlu0 %214  ;;  %v224_v40 = vsel %vm222_vm0, %v217_v37, %v1047_v38  ;;  %v454_v41 = vld [vmem:[#allocation2 + $0x60] sm:$0xf]  ;;  %v460_v38 = vld [vmem:[%s1167_s2 + $0x18] sm:$0xff] }
  0xf9   : > { %v223_v43 = vsel %vm222_vm0, %v215_v39, %v217_v37  ;;  %230 = vst [vmem:[#allocation2] sm:$0xf0] %v224_v40  ;;  %713 = vmatpush.msk.msra.mxu0 %vm494_vm8, %v454_v41  ;;  %732 = vmatpush.msk.msra.mxu3 %vm494_vm8, %v454_v41  ;;  %v445_v48 = vld [vmem:[#allocation2 + $0x18] sm:$0xff] }
  0xfa   : > { %229 = vst [vmem:[#allocation2 + $0x30] sm:$0xf0] %v223_v43  ;;  %v446_v45 = vld [vmem:[#allocation2 + $0x50] sm:$0xff]  ;;  %577 = vmatpush.msra.mxu2 %v444_v44  ;;  %478 = vperm.xlu2 %807, %v460_v38  }
  0xfb   : > { %740 = vmatpush.msra.mxu1 %v446_v45  ;;  %724 = vmatmul.msk.f32.vlgmr.msra.gmra.mxu2 %vm481_vm9, %v438_v42 }
  0xfc   : > { %516 = vmatpush.msra.mxu0 %v451_v46  ;;  %733 = vmatpush.msra.mxu3 %v451_v46 }
  0xfe   : > { %517 = vmatpush.msra.mxu0 %v448_v47  ;;  %734 = vmatpush.msra.mxu3 %v448_v47 }
  0xff   : > { %v474_v4 = vpop.permute.xlu1 %473 }
 0x100   : > { %518 = vmatpush.msra.mxu0 %v445_v48  ;;  %735 = vmatpush.msra.mxu3 %v445_v48  ;;  %v443_v49 = vld [vmem:[#allocation2] sm:$0xff]  ;;  %v469_v57 = vpop.permute.xlu0 %468 }
 0x101   : > { %v442_v51 = vld [vmem:[#allocation2 + $0x30] sm:$0xff]  ;;  %741 = vmatpush.msra.mxu1 %v443_v49 }
 0x102   : > { %519 = vmatpush.msra.mxu0 %v442_v51  ;;  %736 = vmatpush.msra.mxu3 %v442_v51 }
 0x103   : > { %715 = vmatmul.msk.f32.vlgmr.msra.gmra.mxu3 %vm481_vm9, %v439_v50  ;;  %720 = vmatmul.msk.f32.vlgmr.msra.gmra.mxu1 %vm481_vm9, %v439_v50 }
 0x104   : > { %718 = vmatpush.msk.msrb.mxu0 %vm494_vm8, %v1065_v21  ;;  %725 = vmatmul.msk.f32.gmra.mxu2 %vm481_vm9, %v439_v50 }
 0x105   : > { %714 = vmatmul.msk.f32.vlgmr.msra.gmra.mxu0 %vm481_vm9, %v438_v42 }
 0x106   : > { %545 = vmatpush.msrb.mxu0 %v1069_v22 }
 0x108   : > { %546 = vmatpush.msrb.mxu0 %v1072_v23 }
 0x10a   : > { %547 = vmatpush.msrb.mxu0 %v446_v45 }
 0x10b   : > { %716 = vmatmul.msk.f32.gmra.mxu3 %vm481_vm9, %v440_v52  ;;  %721 = vmatmul.msk.f32.gmra.mxu1 %vm481_vm9, %v440_v52 }
 0x10c   : > { %548 = vmatpush.msrb.mxu0 %v443_v49  ;;  %726 = vmatmul.msk.f32.gmra.mxu2 %vm481_vm9, %v440_v52 }
 0x10d   : > { %719 = vmatmul.msk.f32.vlgmr.msrb.gmra.mxu0 %vm481_vm9, %v438_v42 }
 0x113   : > { %717 = vmatmul.msk.f32.gmra.mxu3 %vm481_vm9, %v441_v53  ;;  %722 = vmatmul.msk.f32.gmra.mxu1 %vm481_vm9, %v441_v53 }
 0x114   : > { %727 = vmatmul.msk.f32.gmra.mxu2 %vm481_vm9, %v441_v53 }
 0x154   : > { %v479_v18 = vpop.permute.xlu2 %478 }
 0x17e   : > { %v579_v55 = vpop.f32.mrf.mxu2 }
 0x17f   : > { %v580_v56 = vadd.f32 %v579_v55, %v464_v54 }
 0x180   : > { %v553_v59 = vpop.f32.mrf.mxu1 }
 0x181   : > { %v593_v58 = vmax.f32 %v580_v56, 0.0  ;;  %v554_v60 = vadd.f32 %v553_v59, %v469_v57 }
 0x182   : > { %v521_v61 = vpop.f32.mrf.mxu0 }
 0x183   : > { %605 = vst [vmem:[%s1117_s9 + $0x10] sm:$0xff] %v593_v58  ;;  %v595_v62 = vmax.f32 %v554_v60, 0.0  ;;  %v522_v63 = vadd.f32 %v521_v61, %v464_v54 }
 0x185   : > { %607 = vst [vmem:[%s1117_s9 + $0x20] sm:$0xff] %v595_v62  ;;  %v591_v0 = vmax.f32 %v522_v63, 0.0 }
 0x186   : > { %v524_v1 = vpop.f32.mrf.mxu3 }
 0x187   : > { %v582_v2 = vpop.f32.mrf.mxu2  ;;  %v525_v3 = vadd.f32 %v524_v1, %v469_v57  ;;  %603 = vst [vmem:[%s1117_s9] sm:$0xff] %v591_v0 }
 0x188   : > { %v583_v5 = vadd.f32 %v582_v2, %v469_v57  ;;  %v556_v7 = vpop.f32.mrf.mxu1 }
 0x189   : > { %v594_v6 = vmax.f32 %v525_v3, 0.0  ;;  %v557_v9 = vadd.f32 %v556_v7, %v474_v4 }
 0x18a   : > { %v596_v8 = vmax.f32 %v583_v5, 0.0  ;;  %v550_v10 = vpop.f32.mrf.mxu0 }
 0x18b   : > { %606 = vst [vmem:[%s1117_s9 + $0x18] sm:$0xff] %v594_v6  ;;  %v598_v11 = vmax.f32 %v557_v9, 0.0  ;;  %v551_v12 = vadd.f32 %v550_v10, %v464_v54 }
 0x18c   : > { %608 = vst [vmem:[%s1117_s9 + $0x28] sm:$0xff] %v596_v8 }
 0x18d   : > { %610 = vst [vmem:[%s1117_s9 + $0x38] sm:$0xff] %v598_v11  ;;  %v592_v14 = vmax.f32 %v551_v12, 0.0 }
 0x18e   : > { %v527_v13 = vpop.f32.mrf.mxu3 }
 0x18f   : > { %v585_v15 = vpop.f32.mrf.mxu2  ;;  %v528_v16 = vadd.f32 %v527_v13, %v474_v4  ;;  %604 = vst [vmem:[%s1117_s9 + $0x8] sm:$0xff] %v592_v14 }
 0x190   : > { %v586_v17 = vadd.f32 %v585_v15, %v474_v4  ;;  %v559_v20 = vpop.f32.mrf.mxu1 }
 0x191   : > { %v597_v19 = vmax.f32 %v528_v16, 0.0  ;;  %v560_v22 = vadd.f32 %v559_v20, %v479_v18 }
 0x192   : > { %v599_v21 = vmax.f32 %v586_v17, 0.0 }
 0x193   : > { %609 = vst [vmem:[%s1117_s9 + $0x30] sm:$0xff] %v597_v19  ;;  %v601_v23 = vmax.f32 %v560_v22, 0.0 }
 0x194   : > { %611 = vst [vmem:[%s1117_s9 + $0x40] sm:$0xff] %v599_v21 }
 0x195   : > { %613 = vst [vmem:[%s1117_s9 + $0x50] sm:$0xff] %v601_v23 }
 0x196   : > { %v530_v24 = vpop.f32.mrf.mxu3 }
 0x197   : > { %v531_v25 = vadd.f32 %v530_v24, %v479_v18  ;;  %v588_v26 = vpop.f32.mrf.mxu2 }
 0x198   : > { %v589_v27 = vadd.f32 %v588_v26, %v479_v18 }
 0x199   : > { %v600_v28 = vmax.f32 %v531_v25, 0.0 }
 0x19a   : > { %v602_v29 = vmax.f32 %v589_v27, 0.0 }
 0x19b   : > { %612 = vst [vmem:[%s1117_s9 + $0x48] sm:$0xff] %v600_v28 }
 0x19c   : > { %614 = vst [vmem:[%s1117_s9 + $0x58] sm:$0xff] %v602_v29 }
 0x19d   : > { %867 = shalt.err (!%p864_p8)
}
 0x19e   : > { %s920_s5 = smov 384   ;;  %s921_s6 = smov 24  }
 0x19f   : > { %748 = dma.vmem_to_hbm [thread:$0]  (%p980_p5), %s629_s16, 1536, %s631_s20, %s616_s24, %s920_s5, %s920_s5, %s921_s6  }
 0x1a0 PF: > { %p760_p9 = scmp.ge.s32.totalorder %s906_s15, 2  ;;  %s645_s7 = sand.u32 1, %s894_s12  }
 0x1a1   : > { %s646_s8 = scalar_lea.sflag [#allocation5], %s645_s7 }
 0x1a2   : > { %p755_p10 = pnand %p760_p9, %p984_p6 }
 0x1a4   : > { %p756_p11 = pneg %p755_p10 }
 0x1a6   : > { %889 = dma.done.wait (%p756_p11), %s646_s8, 1536  }
 0x1a7   : > { %891 = vsyncadd (%p756_p11), %s646_s8, 4294965760  ;;  %p14_p12 = scmp.ge.s32.totalorder %s967_s18, 4   ;;  %s1171_s12 = smov %s898_s13 }
 0x1a8   : > { %s1172_s13 = smov %s902_s14  ;;  %s1173_s14 = smov %s978_s21 }
 0x1a9   : > { %s1174_s15 = smov %s967_s18  ;;  %16 = sbr.rel (!%p14_p12) target bundleno = 4 (0x4), region = 85 }
 0x1ae   :  { %652 = vsyncpa [#allocation4], 1 }
 0x1af   :  { %654 = vsyncpa [#allocation4 + $0x1], 1 }
 0x1b0   :  { %655 = vsyncpa [#allocation5], 1 }
 0x1b1   :  { %657 = vsyncpa [#allocation5 + $0x1], 1 }

</bundles_post_ra>
